<compile_context>
chip_gen: v7x
topology: tpu7x:2x2x1
jax: 0.10.0
libtpu: 0.0.40
codegen_flags: <defaults>
</compile_context>

<pallas_src>
import jax
import jax.numpy as jnp
from jax.experimental import pallas as pl
from jax.experimental.pallas import tpu as pltpu

F_IN = 5   # input feature dim (matches Linear(5, ...))
H = 5      # l1 output features (see TODO above)

# Packed-slab row layout (both slabs are (8,128) f32, zero elsewhere):
#   x slab :  row 0 = [x1, 1.0]   row 1 = [x2, 1.0]   row 2 = [x1, 0.0]
#   w slab :  row 0 = [wc, bc ]   row 1 = [wc, bc ]   row 2 = [w2, 0.0]
# where wc = w1 @ w2 (as a row), bc = b1 @ w2 + b2 (scalar at lane F_IN).
# Then  sum(x_slab * w_slab, lanes) = [x1·wc+bc, x2·wc+bc, x1·w2, 0...],
# and rows 0-1 of the output are s[0:2] - s[2].


def net1_kernel(x_ref, w_ref, o_ref):
    prod = x_ref[...] * w_ref[...]                    # one (8,128) VPU multiply
    s = jnp.sum(prod, axis=-1, keepdims=True)         # one XLU lane reduce -> (8,1)
    out = s - s[2:3, :]                               # rows 0-1 hold the answers
    # Full, unmasked (8,128) vreg store; wrapper slices [:2, :1].
    o_ref[...] = jnp.broadcast_to(out, (8, 128)).astype(o_ref.dtype)


def pack_weight_slab(w1, b1, w2, b2):
    """Fold both Linears into one constant slab.  Run ONCE at setup time."""
    wc = (w1 @ w2)[:, 0]                              # (F_IN,)
    bc = (b1 @ w2 + b2)[0, 0]                         # scalar
    w_slab = jnp.zeros((8, 128), jnp.float32)
    w_slab = w_slab.at[0, 0:F_IN].set(wc)
    w_slab = w_slab.at[1, 0:F_IN].set(wc)
    w_slab = w_slab.at[2, 0:F_IN].set(w2[:, 0])
    w_slab = w_slab.at[0, F_IN].set(bc)
    w_slab = w_slab.at[1, F_IN].set(bc)
    return w_slab


@jax.jit
def net1_forward(x1, x2, w_slab):
    batch = x1.shape[0] + x2.shape[0]                 # static: 2

    # Hot-path packing: only the x-dependent rows (tiny pad, fuses cheaply).
    xpack = jnp.concatenate([x1, x2, x1], axis=0).astype(jnp.float32)   # (3, F_IN)
    x_slab = jnp.zeros((8, 128), jnp.float32)
    x_slab = x_slab.at[0:3, 0:F_IN].set(xpack)
    x_slab = x_slab.at[0:2, F_IN].set(1.0)            # bias-fold lanes

    vmem_spec = pl.BlockSpec(memory_space=pltpu.MemorySpace.VMEM)
    out_slab = pl.pallas_call(
        net1_kernel,
        out_shape=jax.ShapeDtypeStruct((8, 128), jnp.float32),
        in_specs=[vmem_spec, vmem_spec],
        out_specs=vmem_spec,
        cost_estimate=pl.CostEstimate(
            flops=64, transcendentals=0, bytes_accessed=3 * 8 * 128 * 4),
    )(x_slab, w_slab)
    return out_slab[:batch, :1]                       # (2, 1), lane-dense store upstream


def reference_forward(x1, x2, w1, b1, w2, b2):
    x = jnp.concatenate([x1, x2], axis=0)
    h = x @ w1 + b1 - x1
    return h @ w2 + b2


if __name__ == "__main__":
    key = jax.random.PRNGKey(0)
    k1, k2, kw1, kb1, kw2, kb2 = jax.random.split(key, 6)

    # Inputs: x1, x2 of shape (1, 5), like torch.randn(1, 5)
    x1 = jax.random.normal(k1, (1, F_IN), dtype=jnp.float32)
    x2 = jax.random.normal(k2, (1, F_IN), dtype=jnp.float32)

    # Deterministic parameter init (Linear-style uniform ranges).
    lim1 = 1.0 / (F_IN ** 0.5)
    w1 = jax.random.uniform(kw1, (F_IN, H), jnp.float32, -lim1, lim1)
    b1 = jax.random.uniform(kb1, (1, H), jnp.float32, -lim1, lim1)
    lim2 = 1.0 / (H ** 0.5)
    w2 = jax.random.uniform(kw2, (H, 1), jnp.float32, -lim2, lim2)
    b2 = jax.random.uniform(kb2, (1, 1), jnp.float32, -lim2, lim2)

    # One-time, off-the-hot-path weight folding.
    w_slab = jax.block_until_ready(pack_weight_slab(w1, b1, w2, b2))

    out = net1_forward(x1, x2, w_slab)
    out = jax.block_until_ready(out)

    ref = reference_forward(x1, x2, w1, b1, w2, b2)
    assert out.shape == (2, 1), out.shape
    assert jnp.allclose(out, ref, atol=1e-5, rtol=1e-5), (out, ref)

    print("KERNEL_OK")
</pallas_src>

<mosaic_0001>
module attributes {stable_mosaic.version = 11 : i64} {
  func.func @net1_kernel(%arg0: memref<8x128xf32, #tpu.memory_space<vmem>>, %arg1: memref<8x128xf32, #tpu.memory_space<vmem>>, %arg2: memref<8x128xf32, #tpu.memory_space<vmem>>) attributes {dimension_semantics = [], scalar_prefetch = 0 : i64, scratch_operands = 0 : i64, tpu.core_type = #tpu.core_type<tc>} {
    %c0 = arith.constant 0 : index
    %c0_0 = arith.constant 0 : index
    %0 = vector.load %arg0[%c0, %c0_0] : memref<8x128xf32, #tpu.memory_space<vmem>>, vector<8x128xf32>
    %c0_1 = arith.constant 0 : index
    %c0_2 = arith.constant 0 : index
    %1 = vector.load %arg1[%c0_1, %c0_2] : memref<8x128xf32, #tpu.memory_space<vmem>>, vector<8x128xf32>
    %2 = arith.mulf %0, %1 : vector<8x128xf32>
    %cst = arith.constant dense<0.000000e+00> : vector<8xf32>
    %3 = vector.multi_reduction <add>, %2, %cst [1] : vector<8x128xf32> to vector<8xf32>
    %4 = vector.shape_cast %3 : vector<8xf32> to vector<8x1xf32>
    %5 = vector.extract_strided_slice %4 {offsets = [2, 0], sizes = [1, 1], strides = [1, 1]} : vector<8x1xf32> to vector<1x1xf32>
    %6 = vector.broadcast %5 : vector<1x1xf32> to vector<8x1xf32>
    %7 = arith.subf %4, %6 : vector<8x1xf32>
    %8 = vector.shape_cast %7 : vector<8x1xf32> to vector<8x1xf32>
    %9 = vector.broadcast %8 : vector<8x1xf32> to vector<8x128xf32>
    %c0_3 = arith.constant 0 : index
    %c0_4 = arith.constant 0 : index
    %10 = vector.load %arg2[%c0_3, %c0_4] : memref<8x128xf32, #tpu.memory_space<vmem>>, vector<8x128xf32>
    tpu.vector_store %arg2[%c0_3, %c0_4], %9 {strides = array<i32>} : memref<8x128xf32, #tpu.memory_space<vmem>>, vector<8x128xf32>,
    return
  }
}

</mosaic_0001>

<bundles_post_ra>
// kernel: net1_forward.1
= control target key start
LH: loop header
LB: loop body
LE: loop exit
PB: predicated region body
PF: predicated region fallthrough
CT: control target
= control target key end

     0   :  { %v16_v3 = vlaneseq  ;;  %s50_s0 = inlined_call_operand.vmem [shape: f32[8,128], index: 0, kind: input, shape index: {}]   ;;  %s51_s1 = inlined_call_operand.vmem [shape: f32[8,128], index: 1, kind: input, shape index: {}]   ;;  %s52_s2 = inlined_call_operand.vmem [shape: f32[8,128], index: 2, kind: output, shape index: {}]  }
   0x1   :  { %v11_v0 = vld [vmem:[%s50_s0] sm:$0xff] }
   0x2   :  { %v12_v1 = vld [vmem:[%s51_s1] sm:$0xff]  ;;  %v17_v4 = vshrl.u32 %v16_v3, 7 }
   0x3   :  { %v13_v2 = vmul.f32 %v12_v1, %v11_v0 }
   0x4   :  { %v18_v5 = vsub.s32 2, %v17_v4 }
   0x5   :  { %14 = vadd.xlane.f32.xlu0 %v13_v2 }
  0x92   :  { %v15_v6 = vpop.xlane.xlu0 %14 }
  0x93   :  { %v19_v7 = vrot.slane %v15_v6, %v18_v5 }
  0x95   :  { %v20_v8 = vsub.f32 %v15_v6, %v19_v7 }
  0x97   :  { %21 = vst [vmem:[%s52_s2] sm:$0xff] %v20_v8 }

</bundles_post_ra>
